<compile_context>
chip_gen: v6e
topology: v6e:2x2x1
jax: 0.10.0
libtpu: 0.0.40
codegen_flags: <defaults>
</compile_context>

<pallas_src>
import functools

import jax
import jax.numpy as jnp
from jax.experimental import pallas as pl
from jax.experimental.pallas import tpu as pltpu

LANES = 128
SUBLANES = 8
ROW_ALIGN = 32          # dtype-proof sublane multiple (f32:8, bf16:16, i8/fp8:32)
MAX_TILE_ROWS = 4096    # 4096 x 128 x 4B = 2 MiB per f32 input block
NUM_CHUNKS = 2          # leading "parallel" grid axis (2 TensorCores on v7x)


def _cdiv(a, b):
    return -(-a // b)


def _round_up(x, m):
    return ((x + m - 1) // m) * m


def _sigmoid_neg(x):
    # sigmoid(-x) = 0.5 - 0.5 * tanh(x / 2): one EUP op + 2 VALU ops, no divide.
    return 0.5 - 0.5 * jnp.tanh(0.5 * x)


def _pu_partial_sums_kernel(x_ref, t_ref, out_ref,
                            s_pos, s_unl, s_pos_ln, s_unl_ln, *,
                            total_rows, tile_rows, steps_per_chunk,
                            full_blocks, needs_mask):
    j = pl.program_id(1)
    blk = pl.program_id(0) * steps_per_chunk + j   # logical (unclamped) block id

    @pl.when(j == 0)
    def _init():
        s_pos[...] = jnp.zeros_like(s_pos)
        s_unl[...] = jnp.zeros_like(s_unl)
        s_pos_ln[...] = jnp.zeros_like(s_pos_ln)
        s_unl_ln[...] = jnp.zeros_like(s_unl_ln)

    x = x_ref[...].astype(jnp.float32)
    t = t_ref[...].astype(jnp.float32)

    def accumulate(xv, tv):
        pos = (tv == 1.0).astype(jnp.float32)     # positive mask
        unl = (tv == -1.0).astype(jnp.float32)    # unlabeled mask
        sig_neg = _sigmoid_neg(xv)                # sigmoid(-x) == loss_fn(x)

        def fold(tile):
            # Fold onto an (8, 128) vreg with pure VPU adds; the cross-lane
            # reduction to scalars happens once, outside the kernel.
            return jnp.sum(
                tile.reshape(tile_rows // SUBLANES, SUBLANES, LANES), axis=0)

        s_pos[...] += fold(pos)
        s_unl[...] += fold(unl)
        s_pos_ln[...] += fold(pos * sig_neg)
        s_unl_ln[...] += fold(unl * sig_neg)

    if needs_mask:
        # Only blocks at/after the array boundary pay for the row mask;
        # steady-state tiles take the unmasked path.
        @pl.when(blk < full_blocks)
        def _steady():
            accumulate(x, t)

        @pl.when(blk >= full_blocks)
        def _edge():
            row_idx = (jax.lax.broadcasted_iota(jnp.int32, (tile_rows, LANES), 0)
                       + blk * tile_rows)
            valid = row_idx < total_rows
            # Out-of-range rows: t -> 0 (neither +1 nor -1), x -> 0 (finite).
            accumulate(jnp.where(valid, x, 0.0), jnp.where(valid, t, 0.0))
    else:
        accumulate(x, t)

    @pl.when(j == pl.num_programs(1) - 1)
    def _finalize():
        out_ref[0, 0] = s_pos[...]
        out_ref[0, 1] = s_unl[...]
        out_ref[0, 2] = s_pos_ln[...]
        out_ref[0, 3] = s_unl_ln[...]


def positive_unlabeled_loss(inputs, target, *, prior=0.4915, beta=0.0,
                            gamma=1.0, loss_fn='sigmoid', is_nnpu=True,
                            max_tile_rows=MAX_TILE_ROWS):
    """Returns (loss, risk) scalars, matching PositiveUnlabeledLoss.forward.

    Notes:
      * `target` may be kept in a narrow dtype (bf16 / int8 hold +/-1 exactly);
        the kernel upcasts per tile, so narrowing upstream cuts HBM traffic.
      * Wrap the caller in jax.jit for production use.
    """
    if prior < 0 or prior > 1:
        raise ValueError(f'class-prior expects 0 <= prior <= 1, but got {prior}')
    if beta < 0 or beta > prior:
        raise ValueError(f'beta expects 0 <= beta <= {prior}, but got {beta}')
    if gamma < 0 or gamma > 1:
        raise ValueError(f'gamma expects 0 <= gamma <= 1, but got {gamma}')
    if loss_fn != 'sigmoid':
        # TODO(synk): 'logistic' loss_fn variant (log1p(exp(-x))) not implemented.
        raise NotImplementedError(
            f"only loss_fn='sigmoid' is implemented, got {loss_fn}")

    n = int(inputs.size)
    x_flat = jnp.ravel(inputs)     # native dtype; kernel upcasts per tile
    t_flat = jnp.ravel(target)

    rows = n // LANES
    main = rows * LANES

    # Partial sums: [count_pos, count_unl, sum(pos*sig(-x)), sum(unl*sig(-x))]
    partials = jnp.zeros((4,), jnp.float32)

    if rows > 0:
        if main == n:
            x2 = x_flat.reshape(rows, LANES)        # free row-major reshape
            t2 = t_flat.reshape(rows, LANES)
        else:
            # Ragged: only the 128-aligned prefix goes through the kernel.
            x2 = x_flat[:main].reshape(rows, LANES)
            t2 = t_flat[:main].reshape(rows, LANES)

        tile_rows = min(_round_up(int(max_tile_rows), ROW_ALIGN),
                        _round_up(rows, ROW_ALIGN))
        n_blocks = _cdiv(rows, tile_rows)
        num_chunks = min(NUM_CHUNKS, n_blocks)
        steps_per_chunk = _cdiv(n_blocks, num_chunks)
        full_blocks = rows // tile_rows
        needs_mask = (num_chunks * steps_per_chunk * tile_rows) > rows

        def in_index_map(c, j):
            blk = c * steps_per_chunk + j
            # Extra blocks past the end (odd block counts) re-read the last
            # valid block; their rows are fully masked out in-kernel.
            return (jnp.minimum(blk, n_blocks - 1), 0)

        kernel = functools.partial(
            _pu_partial_sums_kernel,
            total_rows=rows, tile_rows=tile_rows,
            steps_per_chunk=steps_per_chunk,
            full_blocks=full_blocks, needs_mask=bool(needs_mask))

        part = pl.pallas_call(
            kernel,
            out_shape=jax.ShapeDtypeStruct(
                (num_chunks, 4, SUBLANES, LANES), jnp.float32),
            grid_spec=pltpu.PrefetchScalarGridSpec(
                num_scalar_prefetch=0,
                grid=(num_chunks, steps_per_chunk),
                in_specs=[
                    pl.BlockSpec((tile_rows, LANES), in_index_map),
                    pl.BlockSpec((tile_rows, LANES), in_index_map),
                ],
                out_specs=pl.BlockSpec((1, 4, SUBLANES, LANES),
                                       lambda c, j: (c, 0, 0, 0)),
                scratch_shapes=[pltpu.VMEM((SUBLANES, LANES), jnp.float32)] * 4,
            ),
            compiler_params=pltpu.CompilerParams(
                dimension_semantics=("parallel", "arbitrary")),
        )(x2, t2)
        partials = partials + jnp.sum(part, axis=(0, 2, 3))

    if main < n:
        # Fold the <=127-element ragged tail in plain JAX (no whole-array pad).
        xt = x_flat[main:].astype(jnp.float32)
        tt = t_flat[main:].astype(jnp.float32)
        pos = (tt == 1.0).astype(jnp.float32)
        unl = (tt == -1.0).astype(jnp.float32)
        sn = jax.nn.sigmoid(-xt)
        partials = partials + jnp.stack(
            [jnp.sum(pos), jnp.sum(unl), jnp.sum(pos * sn), jnp.sum(unl * sn)])

    count_pos = partials[0]
    count_unl = partials[1]
    sum_pos_signeg = partials[2]
    sum_unl_signeg = partials[3]
    # sigmoid(x) = 1 - sigmoid(-x)
    sum_pos_sigpos = count_pos - sum_pos_signeg
    sum_unl_sigpos = count_unl - sum_unl_signeg

    n_pos = jnp.maximum(1.0, count_pos)
    n_unl = jnp.maximum(1.0, count_unl)

    positive_risk = prior * sum_pos_signeg / n_pos
    negative_risk = sum_unl_sigpos / n_unl - prior * sum_pos_sigpos / n_pos
    risk = positive_risk + negative_risk
    loss = risk
    if is_nnpu:
        use_nn = negative_risk < -beta
        loss = jnp.where(use_nn, -gamma * negative_risk, loss)
        risk = jnp.where(use_nn, positive_risk - beta, risk)
    return loss, risk


def _reference_pu_loss(inputs, target, *, prior=0.4915, beta=0.0, gamma=1.0,
                       is_nnpu=True):
    x = jnp.ravel(inputs).astype(jnp.float32)
    t = jnp.ravel(target).astype(jnp.float32)
    pos = (t == 1.0).astype(jnp.float32)
    unl = (t == -1.0).astype(jnp.float32)
    n_pos = jnp.maximum(1.0, jnp.sum(pos))
    n_unl = jnp.maximum(1.0, jnp.sum(unl))
    loss_fn = lambda v: jax.nn.sigmoid(-v)
    positive_risk = jnp.sum(prior * pos / n_pos * loss_fn(x))
    negative_risk = jnp.sum((unl / n_unl - prior * pos / n_pos) * loss_fn(-x))
    risk = positive_risk + negative_risk
    loss = risk
    if is_nnpu:
        use_nn = negative_risk < -beta
        loss = jnp.where(use_nn, -gamma * negative_risk, loss)
        risk = jnp.where(use_nn, positive_risk - beta, risk)
    return loss, risk


def _check(inputs, target, **kw):
    loss, risk = positive_unlabeled_loss(inputs, target, **kw)
    loss = jax.block_until_ready(loss)
    risk = jax.block_until_ready(risk)
    ref_kw = {k: v for k, v in kw.items() if k != "max_tile_rows"}
    ref_loss, ref_risk = _reference_pu_loss(inputs, target, **ref_kw)
    assert jnp.allclose(loss, ref_loss, atol=2e-5, rtol=2e-5), (loss, ref_loss)
    assert jnp.allclose(risk, ref_risk, atol=2e-5, rtol=2e-5), (risk, ref_risk)


if __name__ == "__main__":
    key = jax.random.PRNGKey(0)
    ks = jax.random.split(key, 8)

    def mk(kx, kt, shape, p=0.4915, dtype=jnp.float32):
        x = jax.random.normal(kx, shape, dtype=jnp.float32).astype(dtype)
        t = jnp.where(jax.random.bernoulli(kt, p=p, shape=shape),
                      jnp.float32(1.0), jnp.float32(-1.0)).astype(dtype)
        return x, t

    # 1) Main case: small synthetic scores and {+1, -1} PU labels.
    x1, t1 = mk(ks[0], ks[1], (2, 1024))
    _check(x1, t1)

    # 2) Multi-chunk / multi-step grid with a forced small tile size
    #    (odd block count also exercises the clamped extra block).
    x2, t2 = mk(ks[2], ks[3], (2, 5120))
    _check(x2, t2, max_tile_rows=32)

    # 3) Ragged size: 128-aligned prefix through the kernel + wrapper tail fold,
    #    with the plain (non-nnPU) risk estimator.
    x3, t3 = mk(ks[4], ks[5], (3, 87), p=0.5)
    _check(x3, t3, is_nnpu=False)

    # 4) Tiny fully-tail case (< 128 elements): wrapper-only path.
    x4, t4 = mk(ks[6], ks[7], (1, 50))
    _check(x4, t4)

    # 5) Narrow dtype pass-through (kernel upcasts per tile; halves HBM traffic).
    _check(x1.astype(jnp.bfloat16), t1.astype(jnp.bfloat16))

    print("KERNEL_OK")
</pallas_src>

<mosaic_0001>
module attributes {stable_mosaic.version = 11 : i64} {
  func.func @_pu_partial_sums_kernel(%arg0: i32, %arg1: i32, %arg2: memref<32x128xf32, #tpu.memory_space<vmem>>, %arg3: memref<32x128xf32, #tpu.memory_space<vmem>>, %arg4: memref<1x4x8x128xf32, #tpu.memory_space<vmem>>, %arg5: memref<8x128xf32, #tpu.memory_space<vmem>>, %arg6: memref<8x128xf32, #tpu.memory_space<vmem>>, %arg7: memref<8x128xf32, #tpu.memory_space<vmem>>, %arg8: memref<8x128xf32, #tpu.memory_space<vmem>>) attributes {dimension_semantics = [#tpu.dimension_semantics<parallel>, #tpu.dimension_semantics<arbitrary>], iteration_bounds = array<i64: 1, 1>, scalar_prefetch = 0 : i64, scratch_operands = 4 : i64, tpu.core_type = #tpu.core_type<tc>, window_params = [{transform_indices = @transform_0, window_bounds = array<i64: 32, 128>}, {transform_indices = @transform_1, window_bounds = array<i64: 32, 128>}, {transform_indices = @transform_2, window_bounds = array<i64: 1, 4, 8, 128>}]} {
    %c1_i32 = arith.constant 1 : i32
    %0 = arith.muli %arg0, %c1_i32 : i32
    %1 = arith.addi %0, %arg1 : i32
    %c0_i32 = arith.constant 0 : i32
    %2 = arith.cmpi eq, %arg1, %c0_i32 : i32
    %3 = arith.extui %2 : i1 to i32
    %c0_i32_0 = arith.constant 0 : i32
    %4 = arith.cmpi ne, %3, %c0_i32_0 : i32
    scf.if %4 {
      %cst = arith.constant 0.000000e+00 : f32
      %16 = vector.broadcast %cst : f32 to vector<8x128xf32>
      %c0_10 = arith.constant 0 : index
      %c0_11 = arith.constant 0 : index
      %17 = vector.load %arg5[%c0_10, %c0_11] : memref<8x128xf32, #tpu.memory_space<vmem>>, vector<8x128xf32>
      tpu.vector_store %arg5[%c0_10, %c0_11], %16 {strides = array<i32>} : memref<8x128xf32, #tpu.memory_space<vmem>>, vector<8x128xf32>,
      %cst_12 = arith.constant 0.000000e+00 : f32
      %18 = vector.broadcast %cst_12 : f32 to vector<8x128xf32>
      %c0_13 = arith.constant 0 : index
      %c0_14 = arith.constant 0 : index
      %19 = vector.load %arg6[%c0_13, %c0_14] : memref<8x128xf32, #tpu.memory_space<vmem>>, vector<8x128xf32>
      tpu.vector_store %arg6[%c0_13, %c0_14], %18 {strides = array<i32>} : memref<8x128xf32, #tpu.memory_space<vmem>>, vector<8x128xf32>,
      %cst_15 = arith.constant 0.000000e+00 : f32
      %20 = vector.broadcast %cst_15 : f32 to vector<8x128xf32>
      %c0_16 = arith.constant 0 : index
      %c0_17 = arith.constant 0 : index
      %21 = vector.load %arg7[%c0_16, %c0_17] : memref<8x128xf32, #tpu.memory_space<vmem>>, vector<8x128xf32>
      tpu.vector_store %arg7[%c0_16, %c0_17], %20 {strides = array<i32>} : memref<8x128xf32, #tpu.memory_space<vmem>>, vector<8x128xf32>,
      %cst_18 = arith.constant 0.000000e+00 : f32
      %22 = vector.broadcast %cst_18 : f32 to vector<8x128xf32>
      %c0_19 = arith.constant 0 : index
      %c0_20 = arith.constant 0 : index
      %23 = vector.load %arg8[%c0_19, %c0_20] : memref<8x128xf32, #tpu.memory_space<vmem>>, vector<8x128xf32>
      tpu.vector_store %arg8[%c0_19, %c0_20], %22 {strides = array<i32>} : memref<8x128xf32, #tpu.memory_space<vmem>>, vector<8x128xf32>,
    } else {
    }
    %c0 = arith.constant 0 : index
    %c0_1 = arith.constant 0 : index
    %5 = vector.load %arg2[%c0, %c0_1] : memref<32x128xf32, #tpu.memory_space<vmem>>, vector<32x128xf32>
    %c0_2 = arith.constant 0 : index
    %c0_3 = arith.constant 0 : index
    %6 = vector.load %arg3[%c0_2, %c0_3] : memref<32x128xf32, #tpu.memory_space<vmem>>, vector<32x128xf32>
    %c0_i32_4 = arith.constant 0 : i32
    %7 = arith.cmpi slt, %1, %c0_i32_4 : i32
    %8 = arith.extui %7 : i1 to i32
    %c0_i32_5 = arith.constant 0 : i32
    %9 = arith.cmpi ne, %8, %c0_i32_5 : i32
    scf.if %9 {
      %cst = arith.constant 1.000000e+00 : f32
      %16 = vector.broadcast %cst : f32 to vector<32x128xf32>
      %17 = arith.cmpf oeq, %6, %16 : vector<32x128xf32>
      %18 = arith.extui %17 : vector<32x128xi1> to vector<32x128xi32>
      %19 = arith.sitofp %18 : vector<32x128xi32> to vector<32x128xf32>
      %cst_10 = arith.constant -1.000000e+00 : f32
      %20 = vector.broadcast %cst_10 : f32 to vector<32x128xf32>
      %21 = arith.cmpf oeq, %6, %20 : vector<32x128xf32>
      %22 = arith.extui %21 : vector<32x128xi1> to vector<32x128xi32>
      %23 = arith.sitofp %22 : vector<32x128xi32> to vector<32x128xf32>
      %cst_11 = arith.constant 5.000000e-01 : f32
      %24 = vector.broadcast %cst_11 : f32 to vector<32x128xf32>
      %25 = arith.mulf %24, %5 : vector<32x128xf32>
      %26 = math.tanh %25 : vector<32x128xf32>
      %cst_12 = arith.constant 5.000000e-01 : f32
      %27 = vector.broadcast %cst_12 : f32 to vector<32x128xf32>
      %28 = arith.mulf %27, %26 : vector<32x128xf32>
      %cst_13 = arith.constant 5.000000e-01 : f32
      %29 = vector.broadcast %cst_13 : f32 to vector<32x128xf32>
      %30 = arith.subf %29, %28 : vector<32x128xf32>
      %c0_14 = arith.constant 0 : index
      %c0_15 = arith.constant 0 : index
      %31 = vector.load %arg5[%c0_14, %c0_15] : memref<8x128xf32, #tpu.memory_space<vmem>>, vector<8x128xf32>
      %32 = vector.shape_cast %19 : vector<32x128xf32> to vector<4x8x128xf32>
      %cst_16 = arith.constant dense<0.000000e+00> : vector<8x128xf32>
      %33 = vector.multi_reduction <add>, %32, %cst_16 [0] : vector<4x8x128xf32> to vector<8x128xf32>
      %34 = arith.addf %31, %33 : vector<8x128xf32>
      %c0_17 = arith.constant 0 : index
      %c0_18 = arith.constant 0 : index
      %35 = vector.load %arg5[%c0_17, %c0_18] : memref<8x128xf32, #tpu.memory_space<vmem>>, vector<8x128xf32>
      tpu.vector_store %arg5[%c0_17, %c0_18], %34 {strides = array<i32>} : memref<8x128xf32, #tpu.memory_space<vmem>>, vector<8x128xf32>,
      %c0_19 = arith.constant 0 : index
      %c0_20 = arith.constant 0 : index
      %36 = vector.load %arg6[%c0_19, %c0_20] : memref<8x128xf32, #tpu.memory_space<vmem>>, vector<8x128xf32>
      %37 = vector.shape_cast %23 : vector<32x128xf32> to vector<4x8x128xf32>
      %cst_21 = arith.constant dense<0.000000e+00> : vector<8x128xf32>
      %38 = vector.multi_reduction <add>, %37, %cst_21 [0] : vector<4x8x128xf32> to vector<8x128xf32>
      %39 = arith.addf %36, %38 : vector<8x128xf32>
      %c0_22 = arith.constant 0 : index
      %c0_23 = arith.constant 0 : index
      %40 = vector.load %arg6[%c0_22, %c0_23] : memref<8x128xf32, #tpu.memory_space<vmem>>, vector<8x128xf32>
      tpu.vector_store %arg6[%c0_22, %c0_23], %39 {strides = array<i32>} : memref<8x128xf32, #tpu.memory_space<vmem>>, vector<8x128xf32>,
      %c0_24 = arith.constant 0 : index
      %c0_25 = arith.constant 0 : index
      %41 = vector.load %arg7[%c0_24, %c0_25] : memref<8x128xf32, #tpu.memory_space<vmem>>, vector<8x128xf32>
      %42 = arith.mulf %19, %30 : vector<32x128xf32>
      %43 = vector.shape_cast %42 : vector<32x128xf32> to vector<4x8x128xf32>
      %cst_26 = arith.constant dense<0.000000e+00> : vector<8x128xf32>
      %44 = vector.multi_reduction <add>, %43, %cst_26 [0] : vector<4x8x128xf32> to vector<8x128xf32>
      %45 = arith.addf %41, %44 : vector<8x128xf32>
      %c0_27 = arith.constant 0 : index
      %c0_28 = arith.constant 0 : index
      %46 = vector.load %arg7[%c0_27, %c0_28] : memref<8x128xf32, #tpu.memory_space<vmem>>, vector<8x128xf32>
      tpu.vector_store %arg7[%c0_27, %c0_28], %45 {strides = array<i32>} : memref<8x128xf32, #tpu.memory_space<vmem>>, vector<8x128xf32>,
      %c0_29 = arith.constant 0 : index
      %c0_30 = arith.constant 0 : index
      %47 = vector.load %arg8[%c0_29, %c0_30] : memref<8x128xf32, #tpu.memory_space<vmem>>, vector<8x128xf32>
      %48 = arith.mulf %23, %30 : vector<32x128xf32>
      %49 = vector.shape_cast %48 : vector<32x128xf32> to vector<4x8x128xf32>
      %cst_31 = arith.constant dense<0.000000e+00> : vector<8x128xf32>
      %50 = vector.multi_reduction <add>, %49, %cst_31 [0] : vector<4x8x128xf32> to vector<8x128xf32>
      %51 = arith.addf %47, %50 : vector<8x128xf32>
      %c0_32 = arith.constant 0 : index
      %c0_33 = arith.constant 0 : index
      %52 = vector.load %arg8[%c0_32, %c0_33] : memref<8x128xf32, #tpu.memory_space<vmem>>, vector<8x128xf32>
      tpu.vector_store %arg8[%c0_32, %c0_33], %51 {strides = array<i32>} : memref<8x128xf32, #tpu.memory_space<vmem>>, vector<8x128xf32>,
    } else {
    }
    %c0_i32_6 = arith.constant 0 : i32
    %10 = arith.cmpi sge, %1, %c0_i32_6 : i32
    %11 = arith.extui %10 : i1 to i32
    %c0_i32_7 = arith.constant 0 : i32
    %12 = arith.cmpi ne, %11, %c0_i32_7 : i32
    scf.if %12 {
      %16 = tpu.iota {dimensions = array<i32: 0>} : vector<32x128xi32>
      %c32_i32 = arith.constant 32 : i32
      %17 = arith.muli %1, %c32_i32 : i32
      %18 = vector.broadcast %17 : i32 to vector<32x128xi32>
      %19 = arith.addi %16, %18 : vector<32x128xi32>
      %c16_i32 = arith.constant 16 : i32
      %20 = vector.broadcast %c16_i32 : i32 to vector<32x128xi32>
      %21 = arith.cmpi slt, %19, %20 : vector<32x128xi32>
      %cst = arith.constant 0.000000e+00 : f32
      %22 = vector.broadcast %cst : f32 to vector<32x128xf32>
      %23 = arith.select %21, %5, %22 : vector<32x128xi1>, vector<32x128xf32>
      %cst_10 = arith.constant 0.000000e+00 : f32
      %24 = vector.broadcast %cst_10 : f32 to vector<32x128xf32>
      %25 = arith.select %21, %6, %24 : vector<32x128xi1>, vector<32x128xf32>
      %cst_11 = arith.constant 1.000000e+00 : f32
      %26 = vector.broadcast %cst_11 : f32 to vector<32x128xf32>
      %27 = arith.cmpf oeq, %25, %26 : vector<32x128xf32>
      %28 = arith.extui %27 : vector<32x128xi1> to vector<32x128xi32>
      %29 = arith.sitofp %28 : vector<32x128xi32> to vector<32x128xf32>
      %cst_12 = arith.constant -1.000000e+00 : f32
      %30 = vector.broadcast %cst_12 : f32 to vector<32x128xf32>
      %31 = arith.cmpf oeq, %25, %30 : vector<32x128xf32>
      %32 = arith.extui %31 : vector<32x128xi1> to vector<32x128xi32>
      %33 = arith.sitofp %32 : vector<32x128xi32> to vector<32x128xf32>
      %cst_13 = arith.constant 5.000000e-01 : f32
      %34 = vector.broadcast %cst_13 : f32 to vector<32x128xf32>
      %35 = arith.mulf %34, %23 : vector<32x128xf32>
      %36 = math.tanh %35 : vector<32x128xf32>
      %cst_14 = arith.constant 5.000000e-01 : f32
      %37 = vector.broadcast %cst_14 : f32 to vector<32x128xf32>
      %38 = arith.mulf %37, %36 : vector<32x128xf32>
      %cst_15 = arith.constant 5.000000e-01 : f32
      %39 = vector.broadcast %cst_15 : f32 to vector<32x128xf32>
      %40 = arith.subf %39, %38 : vector<32x128xf32>
      %c0_16 = arith.constant 0 : index
      %c0_17 = arith.constant 0 : index
      %41 = vector.load %arg5[%c0_16, %c0_17] : memref<8x128xf32, #tpu.memory_space<vmem>>, vector<8x128xf32>
      %42 = vector.shape_cast %29 : vector<32x128xf32> to vector<4x8x128xf32>
      %cst_18 = arith.constant dense<0.000000e+00> : vector<8x128xf32>
      %43 = vector.multi_reduction <add>, %42, %cst_18 [0] : vector<4x8x128xf32> to vector<8x128xf32>
      %44 = arith.addf %41, %43 : vector<8x128xf32>
      %c0_19 = arith.constant 0 : index
      %c0_20 = arith.constant 0 : index
      %45 = vector.load %arg5[%c0_19, %c0_20] : memref<8x128xf32, #tpu.memory_space<vmem>>, vector<8x128xf32>
      tpu.vector_store %arg5[%c0_19, %c0_20], %44 {strides = array<i32>} : memref<8x128xf32, #tpu.memory_space<vmem>>, vector<8x128xf32>,
      %c0_21 = arith.constant 0 : index
      %c0_22 = arith.constant 0 : index
      %46 = vector.load %arg6[%c0_21, %c0_22] : memref<8x128xf32, #tpu.memory_space<vmem>>, vector<8x128xf32>
      %47 = vector.shape_cast %33 : vector<32x128xf32> to vector<4x8x128xf32>
      %cst_23 = arith.constant dense<0.000000e+00> : vector<8x128xf32>
      %48 = vector.multi_reduction <add>, %47, %cst_23 [0] : vector<4x8x128xf32> to vector<8x128xf32>
      %49 = arith.addf %46, %48 : vector<8x128xf32>
      %c0_24 = arith.constant 0 : index
      %c0_25 = arith.constant 0 : index
      %50 = vector.load %arg6[%c0_24, %c0_25] : memref<8x128xf32, #tpu.memory_space<vmem>>, vector<8x128xf32>
      tpu.vector_store %arg6[%c0_24, %c0_25], %49 {strides = array<i32>} : memref<8x128xf32, #tpu.memory_space<vmem>>, vector<8x128xf32>,
      %c0_26 = arith.constant 0 : index
      %c0_27 = arith.constant 0 : index
      %51 = vector.load %arg7[%c0_26, %c0_27] : memref<8x128xf32, #tpu.memory_space<vmem>>, vector<8x128xf32>
      %52 = arith.mulf %29, %40 : vector<32x128xf32>
      %53 = vector.shape_cast %52 : vector<32x128xf32> to vector<4x8x128xf32>
      %cst_28 = arith.constant dense<0.000000e+00> : vector<8x128xf32>
      %54 = vector.multi_reduction <add>, %53, %cst_28 [0] : vector<4x8x128xf32> to vector<8x128xf32>
      %55 = arith.addf %51, %54 : vector<8x128xf32>
      %c0_29 = arith.constant 0 : index
      %c0_30 = arith.constant 0 : index
      %56 = vector.load %arg7[%c0_29, %c0_30] : memref<8x128xf32, #tpu.memory_space<vmem>>, vector<8x128xf32>
      tpu.vector_store %arg7[%c0_29, %c0_30], %55 {strides = array<i32>} : memref<8x128xf32, #tpu.memory_space<vmem>>, vector<8x128xf32>,
      %c0_31 = arith.constant 0 : index
      %c0_32 = arith.constant 0 : index
      %57 = vector.load %arg8[%c0_31, %c0_32] : memref<8x128xf32, #tpu.memory_space<vmem>>, vector<8x128xf32>
      %58 = arith.mulf %33, %40 : vector<32x128xf32>
      %59 = vector.shape_cast %58 : vector<32x128xf32> to vector<4x8x128xf32>
      %cst_33 = arith.constant dense<0.000000e+00> : vector<8x128xf32>
      %60 = vector.multi_reduction <add>, %59, %cst_33 [0] : vector<4x8x128xf32> to vector<8x128xf32>
      %61 = arith.addf %57, %60 : vector<8x128xf32>
      %c0_34 = arith.constant 0 : index
      %c0_35 = arith.constant 0 : index
      %62 = vector.load %arg8[%c0_34, %c0_35] : memref<8x128xf32, #tpu.memory_space<vmem>>, vector<8x128xf32>
      tpu.vector_store %arg8[%c0_34, %c0_35], %61 {strides = array<i32>} : memref<8x128xf32, #tpu.memory_space<vmem>>, vector<8x128xf32>,
    } else {
    }
    %c0_i32_8 = arith.constant 0 : i32
    %13 = arith.cmpi eq, %arg1, %c0_i32_8 : i32
    %14 = arith.extui %13 : i1 to i32
    %c0_i32_9 = arith.constant 0 : i32
    %15 = arith.cmpi ne, %14, %c0_i32_9 : i32
    scf.if %15 {
      %c0_10 = arith.constant 0 : index
      %c0_11 = arith.constant 0 : index
      %16 = vector.load %arg5[%c0_10, %c0_11] : memref<8x128xf32, #tpu.memory_space<vmem>>, vector<8x128xf32>
      %c0_12 = arith.constant 0 : index
      %c0_13 = arith.constant 0 : index
      %c0_14 = arith.constant 0 : index
      %c0_15 = arith.constant 0 : index
      %17 = vector.load %arg4[%c0_12, %c0_13, %c0_14, %c0_15] : memref<1x4x8x128xf32, #tpu.memory_space<vmem>>, vector<1x1x8x128xf32>
      %18 = vector.shape_cast %17 : vector<1x1x8x128xf32> to vector<8x128xf32>
      %19 = vector.shape_cast %16 : vector<8x128xf32> to vector<1x1x8x128xf32>
      tpu.vector_store %arg4[%c0_12, %c0_13, %c0_14, %c0_15], %19 {strides = array<i32>} : memref<1x4x8x128xf32, #tpu.memory_space<vmem>>, vector<1x1x8x128xf32>,
      %c0_16 = arith.constant 0 : index
      %c0_17 = arith.constant 0 : index
      %20 = vector.load %arg6[%c0_16, %c0_17] : memref<8x128xf32, #tpu.memory_space<vmem>>, vector<8x128xf32>
      %c0_18 = arith.constant 0 : index
      %c1 = arith.constant 1 : index
      %c0_19 = arith.constant 0 : index
      %c0_20 = arith.constant 0 : index
      %21 = vector.load %arg4[%c0_18, %c1, %c0_19, %c0_20] : memref<1x4x8x128xf32, #tpu.memory_space<vmem>>, vector<1x1x8x128xf32>
      %22 = vector.shape_cast %21 : vector<1x1x8x128xf32> to vector<8x128xf32>
      %23 = vector.shape_cast %20 : vector<8x128xf32> to vector<1x1x8x128xf32>
      tpu.vector_store %arg4[%c0_18, %c1, %c0_19, %c0_20], %23 {strides = array<i32>} : memref<1x4x8x128xf32, #tpu.memory_space<vmem>>, vector<1x1x8x128xf32>,
      %c0_21 = arith.constant 0 : index
      %c0_22 = arith.constant 0 : index
      %24 = vector.load %arg7[%c0_21, %c0_22] : memref<8x128xf32, #tpu.memory_space<vmem>>, vector<8x128xf32>
      %c0_23 = arith.constant 0 : index
      %c2 = arith.constant 2 : index
      %c0_24 = arith.constant 0 : index
      %c0_25 = arith.constant 0 : index
      %25 = vector.load %arg4[%c0_23, %c2, %c0_24, %c0_25] : memref<1x4x8x128xf32, #tpu.memory_space<vmem>>, vector<1x1x8x128xf32>
      %26 = vector.shape_cast %25 : vector<1x1x8x128xf32> to vector<8x128xf32>
      %27 = vector.shape_cast %24 : vector<8x128xf32> to vector<1x1x8x128xf32>
      tpu.vector_store %arg4[%c0_23, %c2, %c0_24, %c0_25], %27 {strides = array<i32>} : memref<1x4x8x128xf32, #tpu.memory_space<vmem>>, vector<1x1x8x128xf32>,
      %c0_26 = arith.constant 0 : index
      %c0_27 = arith.constant 0 : index
      %28 = vector.load %arg8[%c0_26, %c0_27] : memref<8x128xf32, #tpu.memory_space<vmem>>, vector<8x128xf32>
      %c0_28 = arith.constant 0 : index
      %c3 = arith.constant 3 : index
      %c0_29 = arith.constant 0 : index
      %c0_30 = arith.constant 0 : index
      %29 = vector.load %arg4[%c0_28, %c3, %c0_29, %c0_30] : memref<1x4x8x128xf32, #tpu.memory_space<vmem>>, vector<1x1x8x128xf32>
      %30 = vector.shape_cast %29 : vector<1x1x8x128xf32> to vector<8x128xf32>
      %31 = vector.shape_cast %28 : vector<8x128xf32> to vector<1x1x8x128xf32>
      tpu.vector_store %arg4[%c0_28, %c3, %c0_29, %c0_30], %31 {strides = array<i32>} : memref<1x4x8x128xf32, #tpu.memory_space<vmem>>, vector<1x1x8x128xf32>,
    } else {
    }
    return
  }
  func.func @transform_0(%arg0: i32, %arg1: i32) -> (i32, i32) {
    %c1_i32 = arith.constant 1 : i32
    %0 = arith.muli %arg0, %c1_i32 : i32
    %1 = arith.addi %0, %arg1 : i32
    %c0_i32 = arith.constant 0 : i32
    %2 = arith.minsi %1, %c0_i32 : i32
    %c0_i32_0 = arith.constant 0 : i32
    %c0_i32_1 = arith.constant 0 : i32
    return %2, %c0_i32_0 : i32, i32
  }
  func.func @transform_1(%arg0: i32, %arg1: i32) -> (i32, i32) {
    %c1_i32 = arith.constant 1 : i32
    %0 = arith.muli %arg0, %c1_i32 : i32
    %1 = arith.addi %0, %arg1 : i32
    %c0_i32 = arith.constant 0 : i32
    %2 = arith.minsi %1, %c0_i32 : i32
    %c0_i32_0 = arith.constant 0 : i32
    %c0_i32_1 = arith.constant 0 : i32
    return %2, %c0_i32_0 : i32, i32
  }
  func.func @transform_2(%arg0: i32, %arg1: i32) -> (i32, i32, i32, i32) {
    %c0_i32 = arith.constant 0 : i32
    %c0_i32_0 = arith.constant 0 : i32
    %c0_i32_1 = arith.constant 0 : i32
    %c0_i32_2 = arith.constant 0 : i32
    return %arg0, %c0_i32, %c0_i32_0, %c0_i32_1 : i32, i32, i32, i32
  }
}

</mosaic_0001>

<bundles_post_ra>
// kernel: tpu_custom_call.1
= control target key start
LH: loop header
LB: loop body
LE: loop exit
PB: predicated region body
PF: predicated region fallthrough
CT: control target
= control target key end

     0   :  { %7 = vsyncpa [#allocation7], 0  ;;  %s427_s0 = inlined_call_operand.hbm [shape: f32[16,128], index: 0, kind: input, shape index: {}]   ;;  %s428_s1 = inlined_call_operand.hbm [shape: f32[16,128], index: 1, kind: input, shape index: {}]   ;;  %s429_s2 = inlined_call_operand.hbm [shape: f32[1,4,8,128], index: 2, kind: output, shape index: {}]  }
   0x1   :  { %8 = vsyncpa [#allocation10], 0 }
   0x2   :  { %9 = vsyncpa [#allocation8], 0 }
   0x3   :  { %20 = vsyncadd [#allocation7], 256  ;;  %s388_s9 = smov [#allocation6]  }
   0x4   :  { %s25_s10 = sshll.u32 %s388_s9, 4  ;;  %s26_s10 = int_to_ptr.vmem [resolvable:$true] %s25_s10 }
   0x5   :  { %s330_s11 = scalar_lea.vmem %s26_s10, 256  ;;  %s334_s12 = scalar_lea.vmem %s26_s10, 512 }
   0x6   :  { %p331_p0 = scmp.ne.s32.totalorder %s26_s10, %s330_s11  ;;  %p335_p1 = scmp.lt.s32.totalorder %s26_s10, %s26_s10 }
   0x7   :  { %p336_p2 = scmp.lt.s32.totalorder %s334_s12, %s330_s11 }
   0x9   :  { %p337_p3 = por %p336_p2, %p335_p1 }
   0xb   :  { %p338_p4 = pnand %p337_p3, %p331_p0 }
   0xd   :  { %341 = shalt.err (!%p338_p4)
}
   0xe   :  { %s389_s13 = smov 128   ;;  %s390_s14 = smov 8  }
   0xf   :  { %31 = dma.hbm_to_vmem [thread:$0]  %s427_s0, 256, %s26_s10, [#allocation7], %s389_s13, %s389_s13, %s390_s14  }
  0x10   :  { %42 = vsyncadd [#allocation10], 256  ;;  %s391_s17 = smov [#allocation9]  }
  0x11   :  { %s47_s18 = sshll.u32 %s391_s17, 4  ;;  %s48_s18 = int_to_ptr.vmem [resolvable:$true] %s47_s18 }
  0x12   :  { %s350_s19 = scalar_lea.vmem %s48_s18, 256  ;;  %s354_s20 = scalar_lea.vmem %s48_s18, 512 }
  0x13   :  { %p351_p5 = scmp.ne.s32.totalorder %s48_s18, %s350_s19  ;;  %p355_p6 = scmp.lt.s32.totalorder %s48_s18, %s48_s18 }
  0x14   :  { %p356_p7 = scmp.lt.s32.totalorder %s354_s20, %s350_s19 }
  0x16   :  { %p357_p8 = por %p356_p7, %p355_p6 }
  0x18   :  { %p358_p9 = pnand %p357_p8, %p351_p5 }
  0x1a   :  { %361 = shalt.err (!%p358_p9)
}
  0x1b   :  { %53 = dma.hbm_to_vmem [thread:$0]  %s428_s1, 256, %s48_s18, [#allocation10], %s389_s13, %s389_s13, %s390_s14  }
  0x1c   :  { %382 = dma.done.wait [#allocation7], 512  }
  0x1d   :  { %383 = vsyncadd [#allocation7], 4294966784 }
  0x1e   :  { %384 = dma.done.wait [#allocation10], 512  }
  0x1f   :  { %385 = vsyncadd [#allocation10], 4294966784  ;;  %v85_v0 = vld [vmem:[#allocation9] sm:$0xff]  ;;  %v86_v1 = vld [vmem:[#allocation9 + $0x8] sm:$0xff]  ;;  %v392_v4 = vmov 0.0   ;;  %s393_s0 = smov [#allocation11]  }
  0x20   :  { %v81_v2 = vld [vmem:[#allocation6] sm:$0xff]  ;;  %vm192_vm0 = vcmp.eq.f32.partialorder %v85_v0, 1.0  ;;  %vm193_vm1 = vcmp.eq.f32.partialorder %v86_v1, 1.0  ;;  %vm204_vm2 = vcmp.eq.f32.partialorder %v85_v0, -1.0  ;;  %vm205_vm3 = vcmp.eq.f32.partialorder %v86_v1, -1.0  ;;  %v82_v3 = vld [vmem:[#allocation6 + $0x8] sm:$0xff] }
  0x21   :  { %v308_v5 = vsel %vm192_vm0, 1.0, %v392_v4  ;;  %v309_v6 = vsel %vm193_vm1, 1.0, %v392_v4  ;;  %v310_v7 = vsel %vm204_vm2, 1.0, %v392_v4  ;;  %v311_v8 = vsel %vm205_vm3, 1.0, %v392_v4  ;;  %s283_s1 = sshll.u32 %s393_s0, 4  ;;  %s284_s1 = int_to_ptr.vmem [resolvable:$true] %s283_s1 }
  0x22   :  { %v233_v9 = vadd.f32 %v309_v6, %v308_v5  ;;  %v239_v10 = vadd.f32 %v311_v8, %v310_v7  ;;  %v216_v11 = vmul.f32 0.5, %v81_v2  ;;  %v217_v12 = vmul.f32 0.5, %v82_v3  ;;  %s362_s23 = scalar_lea.vmem %s284_s1, 512  ;;  %p367_p11 = scmp.lt.s32.totalorder %s284_s1, %s284_s1 }
  0x23   :  { %p363_p10 = scmp.ne.s32.totalorder %s284_s1, %s362_s23  ;;  %p368_p12 = scmp.lt.s32.totalorder %s362_s23, %s362_s23 }
  0x24   :  { %268 = vst [vmem:[#allocation11] sm:$0xff] %v233_v9  ;;  %271 = vst [vmem:[#allocation11 + $0x8] sm:$0xff] %v239_v10  ;;  %318 = vtanh.f32 %v216_v11 }
  0x25   :  { %320 = vtanh.f32 %v217_v12  ;;  %p369_p13 = por %p368_p12, %p367_p11 }
  0x27   :  { %p370_p0 = pnand %p369_p13, %p363_p10 }
  0x31   :  { %v319_v13 = vpop.eup %318 }
  0x32   :  { %v321_v14 = vpop.eup %320  ;;  %v224_v15 = vmul.f32 0.5, %v319_v13 }
  0x33   :  { %v225_v16 = vmul.f32 0.5, %v321_v14 }
  0x34   :  { %v228_v17 = vsub.f32 0.5, %v224_v15 }
  0x35   :  { %v229_v18 = vsub.f32 0.5, %v225_v16 }
  0x36   :  { %v245_v19 = vmul.f32 %v308_v5, %v228_v17  ;;  %v255_v20 = vmul.f32 %v310_v7, %v228_v17 }
  0x37   :  { %v246_v21 = vmul.f32 %v309_v6, %v229_v18  ;;  %v256_v22 = vmul.f32 %v311_v8, %v229_v18 }
  0x39   :  { %v249_v23 = vadd.f32 %v246_v21, %v245_v19  ;;  %v259_v24 = vadd.f32 %v256_v22, %v255_v20 }
  0x3b   :  { %274 = vst [vmem:[#allocation11 + $0x10] sm:$0xff] %v249_v23  ;;  %277 = vst [vmem:[#allocation11 + $0x18] sm:$0xff] %v259_v24 }
  0x3c   :  { %373 = shalt.err (!%p370_p0)
}
  0x3d   :  { %289 = dma.vmem_to_hbm [thread:$0]  %s284_s1, 512, %s429_s2, [#allocation8], %s389_s13, %s389_s13, %s390_s14  }
  0x3e   :  { %386 = dma.done.wait [#allocation8], 512  }
  0x3f   :  { %387 = vsyncadd [#allocation8], 4294966784 }
  0x40   :  { %293 = vsyncpa [#allocation7], 1 }
  0x41   :  { %294 = vsyncpa [#allocation10], 1 }
  0x42   :  { %295 = vsyncpa [#allocation8], 1 }

</bundles_post_ra>
